<compile_context>
chip_gen: v7x
topology: tpu7x:2x2x1
jax: 0.10.0
libtpu: 0.0.40
codegen_flags: <defaults>
</compile_context>

<pallas_src>
import functools

import jax
import jax.numpy as jnp
import numpy as np
from jax.experimental import pallas as pl
from jax.experimental.pallas import tpu as pltpu


# ---------------------------------------------------------------------------
# Pallas kernel
# ---------------------------------------------------------------------------
def _postnet_kernel(num_layers, *refs):
    """refs = (x_ref, w0_ref, b0_ref, w1_ref, b1_ref, ..., o_ref).

    x_ref : (1, C_in, tile_t)   input tile, NCT layout, T on lanes
    wl    : (C_out_l, C_in_l)   Conv1d weight with kernel dim squeezed
    bl    : (C_out_l, 1)        bias, broadcast along time
    o_ref : (1, C_out, tile_t)
    """
    x_ref = refs[0]
    o_ref = refs[-1]

    h = x_ref[0].astype(jnp.float32)                            # (C_in, tile_t)
    for layer in range(num_layers):
        w = refs[1 + 2 * layer][...].astype(jnp.float32)        # (C_out_l, C_in_l)
        b = refs[2 + 2 * layer][...].astype(jnp.float32)        # (C_out_l, 1)
        h = jnp.maximum(h, 0.0)                                 # ReLU (nonlinear1d)
        h = jnp.dot(w, h, preferred_element_type=jnp.float32) + b   # Conv1d k=1
    o_ref[0] = h.astype(o_ref.dtype)


def postnet_pallas(x_nct, weights, biases, *, tile_t=1024, param_dtype=None):
    """Run PostNet forward.

    x_nct       : (B, C_in, T)  (PyTorch NCT layout; f32 or bf16)
    weights     : list of (C_out_l, C_in_l) effective conv weights (kernel dim squeezed)
    biases      : list of (C_out_l,) biases
    tile_t      : time-tile size; rounded to a multiple of 128 (lane width)
    param_dtype : optionally cast weights/biases (e.g. jnp.bfloat16 on v6e/v7x);
                  accumulation stays f32 inside the kernel.
    returns     : (B, C_out_last, T)
    """
    num_layers = len(weights)
    B, C_in, T = x_nct.shape
    C_out = weights[-1].shape[0]

    # Lane-dense time tiling: tile_t is a multiple of 128, clamped for small T.
    t_round = 128 * pl.cdiv(T, 128)
    tile_t = int(min(int(tile_t), t_round))
    tile_t = max(128, 128 * (tile_t // 128))
    num_t = pl.cdiv(T, tile_t)
    T_pad = num_t * tile_t

    if T_pad != T:
        # Zero-pad the tail tile; Conv1d(k=1) is per-timestep so padded columns
        # never contaminate valid outputs and are sliced away below.
        x_nct = jnp.pad(x_nct, ((0, 0), (0, 0), (0, T_pad - T)))

    if param_dtype is not None:
        weights = [w.astype(param_dtype) for w in weights]
        biases = [b.astype(param_dtype) for b in biases]
    b_col = [b.reshape(-1, 1) for b in biases]                  # (C_out_l, 1)

    in_specs = [pl.BlockSpec((1, C_in, tile_t), lambda b, t: (b, 0, t))]
    operands = [x_nct]
    for w, bias in zip(weights, b_col):
        # Constant index maps -> weights/biases stay VMEM-resident across grid.
        in_specs.append(pl.BlockSpec(w.shape, lambda b, t: (0, 0)))
        in_specs.append(pl.BlockSpec(bias.shape, lambda b, t: (0, 0)))
        operands.append(w)
        operands.append(bias)

    out = pl.pallas_call(
        functools.partial(_postnet_kernel, num_layers),
        out_shape=jax.ShapeDtypeStruct((B, C_out, T_pad), x_nct.dtype),
        grid_spec=pltpu.PrefetchScalarGridSpec(
            num_scalar_prefetch=0,
            grid=(B, num_t),
            in_specs=in_specs,
            out_specs=pl.BlockSpec((1, C_out, tile_t), lambda b, t: (b, 0, t)),
        ),
        compiler_params=pltpu.CompilerParams(
            dimension_semantics=("parallel", "parallel")),
    )(*operands)

    if T_pad != T:
        out = out[:, :, :T]
    return out


# ---------------------------------------------------------------------------
# Parameter construction (deterministic, mirrors PostNet.__init__ shapes)
# ---------------------------------------------------------------------------
def make_postnet_params(key, in_channels, out_channels, num_layers):
    """Build weight-normed Conv1d(kernel_size=1) params for each PostBlock.

    weight_norm (dim=0): effective_weight = g * v / ||v||  with the norm taken
    per output channel over (in_channels, kernel_size). Computed here in glue.
    """
    weights, biases = [], []
    for layer_idx in range(num_layers):
        c_out = out_channels if layer_idx == num_layers - 1 else in_channels
        key, kv, kg, kb = jax.random.split(key, 4)
        v = jax.random.normal(kv, (c_out, in_channels, 1), jnp.float32) * 0.3
        g = jax.random.uniform(kg, (c_out, 1, 1), jnp.float32,
                               minval=0.5, maxval=1.5)
        bias = jax.random.normal(kb, (c_out,), jnp.float32) * 0.1
        v_norm = jnp.sqrt(jnp.sum(v * v, axis=(1, 2), keepdims=True))
        w_eff = (g * v / v_norm).squeeze(-1)          # (c_out, in_channels)
        weights.append(w_eff)
        biases.append(bias)
    return weights, biases


# ---------------------------------------------------------------------------
# Pure-JAX reference (mirrors the PyTorch forward exactly)
# ---------------------------------------------------------------------------
def postnet_ref(x_nct, weights, biases):
    x = x_nct
    for w, b in zip(weights, biases):
        x = jnp.maximum(x, 0.0)                                  # ReLU
        x = jnp.einsum("oc,bct->bot", w, x) + b[None, :, None]   # Conv1d k=1
    return x


if __name__ == "__main__":
    key = jax.random.PRNGKey(0)

    # Small shapes: batch=2, in_channels=16, out_channels=8, T=300, 3 layers.
    # T is deliberately NOT a multiple of the tile to exercise tail padding.
    B, C_IN, C_OUT, T, NUM_LAYERS = 2, 16, 8, 300, 3

    key, kx = jax.random.split(key)
    x = jax.random.normal(kx, (B, C_IN, T), jnp.float32)

    weights, biases = make_postnet_params(key, C_IN, C_OUT, NUM_LAYERS)

    # param_dtype=jnp.bfloat16 is a drop-in on v6e/v7x; f32 here keeps the
    # validation tolerance tight.
    out = postnet_pallas(x, weights, biases, tile_t=1024)
    out = jax.block_until_ready(out)

    ref = postnet_ref(x, weights, biases)
    assert out.shape == ref.shape, (out.shape, ref.shape)
    np.testing.assert_allclose(np.asarray(out), np.asarray(ref),
                               rtol=1e-5, atol=1e-5)

    print("KERNEL_OK")
</pallas_src>

<mosaic_0001>
module attributes {stable_mosaic.version = 11 : i64} {
  func.func @_postnet_kernel(%arg0: i32, %arg1: i32, %arg2: memref<1x16x384xf32, #tpu.memory_space<vmem>>, %arg3: memref<16x16xf32, #tpu.memory_space<vmem>>, %arg4: memref<16x1xf32, #tpu.memory_space<vmem>>, %arg5: memref<16x16xf32, #tpu.memory_space<vmem>>, %arg6: memref<16x1xf32, #tpu.memory_space<vmem>>, %arg7: memref<8x16xf32, #tpu.memory_space<vmem>>, %arg8: memref<8x1xf32, #tpu.memory_space<vmem>>, %arg9: memref<1x8x384xf32, #tpu.memory_space<vmem>>) attributes {dimension_semantics = [#tpu.dimension_semantics<parallel>, #tpu.dimension_semantics<parallel>], iteration_bounds = array<i64: 2, 1>, scalar_prefetch = 0 : i64, scratch_operands = 0 : i64, tpu.core_type = #tpu.core_type<tc>, window_params = [{transform_indices = @transform_0, window_bounds = array<i64: 1, 16, 384>}, {pipeline_mode = #tpu.pipeline_mode<synchronous>, transform_indices = @transform_1, window_bounds = array<i64: 16, 16>}, {pipeline_mode = #tpu.pipeline_mode<synchronous>, transform_indices = @transform_2, window_bounds = array<i64: 16, 1>}, {pipeline_mode = #tpu.pipeline_mode<synchronous>, transform_indices = @transform_3, window_bounds = array<i64: 16, 16>}, {pipeline_mode = #tpu.pipeline_mode<synchronous>, transform_indices = @transform_4, window_bounds = array<i64: 16, 1>}, {pipeline_mode = #tpu.pipeline_mode<synchronous>, transform_indices = @transform_5, window_bounds = array<i64: 8, 16>}, {pipeline_mode = #tpu.pipeline_mode<synchronous>, transform_indices = @transform_6, window_bounds = array<i64: 8, 1>}, {transform_indices = @transform_7, window_bounds = array<i64: 1, 8, 384>}]} {
    %c0 = arith.constant 0 : index
    %c0_0 = arith.constant 0 : index
    %c0_1 = arith.constant 0 : index
    %0 = vector.load %arg2[%c0, %c0_0, %c0_1] : memref<1x16x384xf32, #tpu.memory_space<vmem>>, vector<1x16x384xf32>
    %1 = vector.shape_cast %0 : vector<1x16x384xf32> to vector<16x384xf32>
    %c0_2 = arith.constant 0 : index
    %c0_3 = arith.constant 0 : index
    %2 = vector.load %arg3[%c0_2, %c0_3] : memref<16x16xf32, #tpu.memory_space<vmem>>, vector<16x16xf32>
    %c0_4 = arith.constant 0 : index
    %c0_5 = arith.constant 0 : index
    %3 = vector.load %arg4[%c0_4, %c0_5] : memref<16x1xf32, #tpu.memory_space<vmem>>, vector<16x1xf32>
    %cst = arith.constant 0.000000e+00 : f32
    %4 = vector.broadcast %cst : f32 to vector<16x384xf32>
    %5 = arith.maximumf %1, %4 : vector<16x384xf32>
    %cst_6 = arith.constant dense<0.000000e+00> : vector<16x384xf32>
    %6 = tpu.matmul %2, %5, %cst_6 {dimension_numbers = #tpu.dot_dimension_numbers<[1], [0], [0], [1], [0, 0, 1, 1], [], []>} : vector<16x16xf32>, vector<16x384xf32>, vector<16x384xf32> -> vector<16x384xf32>
    %7 = vector.broadcast %3 : vector<16x1xf32> to vector<16x384xf32>
    %8 = arith.addf %6, %7 : vector<16x384xf32>
    %c0_7 = arith.constant 0 : index
    %c0_8 = arith.constant 0 : index
    %9 = vector.load %arg5[%c0_7, %c0_8] : memref<16x16xf32, #tpu.memory_space<vmem>>, vector<16x16xf32>
    %c0_9 = arith.constant 0 : index
    %c0_10 = arith.constant 0 : index
    %10 = vector.load %arg6[%c0_9, %c0_10] : memref<16x1xf32, #tpu.memory_space<vmem>>, vector<16x1xf32>
    %cst_11 = arith.constant 0.000000e+00 : f32
    %11 = vector.broadcast %cst_11 : f32 to vector<16x384xf32>
    %12 = arith.maximumf %8, %11 : vector<16x384xf32>
    %cst_12 = arith.constant dense<0.000000e+00> : vector<16x384xf32>
    %13 = tpu.matmul %9, %12, %cst_12 {dimension_numbers = #tpu.dot_dimension_numbers<[1], [0], [0], [1], [0, 0, 1, 1], [], []>} : vector<16x16xf32>, vector<16x384xf32>, vector<16x384xf32> -> vector<16x384xf32>
    %14 = vector.broadcast %10 : vector<16x1xf32> to vector<16x384xf32>
    %15 = arith.addf %13, %14 : vector<16x384xf32>
    %c0_13 = arith.constant 0 : index
    %c0_14 = arith.constant 0 : index
    %16 = vector.load %arg7[%c0_13, %c0_14] : memref<8x16xf32, #tpu.memory_space<vmem>>, vector<8x16xf32>
    %c0_15 = arith.constant 0 : index
    %c0_16 = arith.constant 0 : index
    %17 = vector.load %arg8[%c0_15, %c0_16] : memref<8x1xf32, #tpu.memory_space<vmem>>, vector<8x1xf32>
    %cst_17 = arith.constant 0.000000e+00 : f32
    %18 = vector.broadcast %cst_17 : f32 to vector<16x384xf32>
    %19 = arith.maximumf %15, %18 : vector<16x384xf32>
    %cst_18 = arith.constant dense<0.000000e+00> : vector<8x384xf32>
    %20 = tpu.matmul %16, %19, %cst_18 {dimension_numbers = #tpu.dot_dimension_numbers<[1], [0], [0], [1], [0, 0, 1, 1], [], []>} : vector<8x16xf32>, vector<16x384xf32>, vector<8x384xf32> -> vector<8x384xf32>
    %21 = vector.broadcast %17 : vector<8x1xf32> to vector<8x384xf32>
    %22 = arith.addf %20, %21 : vector<8x384xf32>
    %c0_19 = arith.constant 0 : index
    %c0_20 = arith.constant 0 : index
    %c0_21 = arith.constant 0 : index
    %23 = vector.load %arg9[%c0_19, %c0_20, %c0_21] : memref<1x8x384xf32, #tpu.memory_space<vmem>>, vector<1x8x384xf32>
    %24 = vector.shape_cast %23 : vector<1x8x384xf32> to vector<8x384xf32>
    %25 = vector.shape_cast %22 : vector<8x384xf32> to vector<1x8x384xf32>
    tpu.vector_store %arg9[%c0_19, %c0_20, %c0_21], %25 {strides = array<i32>} : memref<1x8x384xf32, #tpu.memory_space<vmem>>, vector<1x8x384xf32>,
    return
  }
  func.func @transform_0(%arg0: i32, %arg1: i32) -> (i32, i32, i32) {
    %c0_i32 = arith.constant 0 : i32
    %c0_i32_0 = arith.constant 0 : i32
    return %arg0, %c0_i32, %arg1 : i32, i32, i32
  }
  func.func @transform_1(%arg0: i32, %arg1: i32) -> (i32, i32) {
    %c0_i32 = arith.constant 0 : i32
    %c0_i32_0 = arith.constant 0 : i32
    %c0_i32_1 = arith.constant 0 : i32
    return %c0_i32, %c0_i32_0 : i32, i32
  }
  func.func @transform_2(%arg0: i32, %arg1: i32) -> (i32, i32) {
    %c0_i32 = arith.constant 0 : i32
    %c0_i32_0 = arith.constant 0 : i32
    %c0_i32_1 = arith.constant 0 : i32
    return %c0_i32, %c0_i32_0 : i32, i32
  }
  func.func @transform_3(%arg0: i32, %arg1: i32) -> (i32, i32) {
    %c0_i32 = arith.constant 0 : i32
    %c0_i32_0 = arith.constant 0 : i32
    %c0_i32_1 = arith.constant 0 : i32
    return %c0_i32, %c0_i32_0 : i32, i32
  }
  func.func @transform_4(%arg0: i32, %arg1: i32) -> (i32, i32) {
    %c0_i32 = arith.constant 0 : i32
    %c0_i32_0 = arith.constant 0 : i32
    %c0_i32_1 = arith.constant 0 : i32
    return %c0_i32, %c0_i32_0 : i32, i32
  }
  func.func @transform_5(%arg0: i32, %arg1: i32) -> (i32, i32) {
    %c0_i32 = arith.constant 0 : i32
    %c0_i32_0 = arith.constant 0 : i32
    %c0_i32_1 = arith.constant 0 : i32
    return %c0_i32, %c0_i32_0 : i32, i32
  }
  func.func @transform_6(%arg0: i32, %arg1: i32) -> (i32, i32) {
    %c0_i32 = arith.constant 0 : i32
    %c0_i32_0 = arith.constant 0 : i32
    %c0_i32_1 = arith.constant 0 : i32
    return %c0_i32, %c0_i32_0 : i32, i32
  }
  func.func @transform_7(%arg0: i32, %arg1: i32) -> (i32, i32, i32) {
    %c0_i32 = arith.constant 0 : i32
    %c0_i32_0 = arith.constant 0 : i32
    return %arg0, %c0_i32, %arg1 : i32, i32, i32
  }
}

</mosaic_0001>

<bundles_post_ra>
// kernel: tpu_custom_call.1
= control target key start
LH: loop header
LB: loop body
LE: loop exit
PB: predicated region body
PF: predicated region fallthrough
CT: control target
= control target key end

     0   :  { %12 = vsyncpa [#allocation3], 0  ;;  %s1472_s0 = inlined_call_operand.hbm [shape: f32[2,16,384], index: 0, kind: input, shape index: {}]   ;;  %s1473_s1 = inlined_call_operand.vmem [shape: f32[16,16], index: 1, kind: input, shape index: {}]   ;;  %s1474_s2 = inlined_call_operand.vmem [shape: f32[16,1], index: 2, kind: input, shape index: {}]   ;;  %s1475_s3 = inlined_call_operand.vmem [shape: f32[16,16], index: 3, kind: input, shape index: {}]   ;;  %s1476_s4 = inlined_call_operand.vmem [shape: f32[16,1], index: 4, kind: input, shape index: {}]   ;;  %s1477_s5 = inlined_call_operand.vmem [shape: f32[8,16], index: 5, kind: input, shape index: {}]   ;;  %s1478_s6 = inlined_call_operand.vmem [shape: f32[8,1], index: 6, kind: input, shape index: {}]   ;;  %s1479_s7 = inlined_call_operand.hbm [shape: f32[2,8,384], index: 7, kind: output, shape index: {}]  }
   0x1   :  { %14 = vsyncpa [#allocation3 + $0x1], 0 }
   0x2   :  { %15 = vsyncpa [#allocation4], 0 }
   0x3   :  { %17 = vsyncpa [#allocation4 + $0x1], 0  ;;  %s1252_s24 = smov 0   ;;  %s1254_s25 = smov 0  }
   0x4   :  { %s1256_s26 = smov 0   ;;  %s1258_s27 = smov 0  }
   0x5   :  { %s1260_s28 = smov 0   ;;  %s1262_s29 = smov 0  }
   0x6 LB: > { %s941_s30 = sadd.s32 4294967295, %s1202_s29   ;;  %s942_s8 = sadd.s32 4294967294, %s1202_s29   ;;  %s1202_s29 = sphi %s1262_s29, %s23_s29   ;;  %s1198_s28 = sphi %s1260_s28, %s1494_s28   ;;  %s1194_s27 = sphi %s1258_s27, %s1493_s27   ;;  %s1190_s26 = sphi %s1256_s26, %s1492_s26   ;;  %s1186_s25 = sphi %s1254_s25, %s1491_s25   ;;  %s1182_s24 = sphi %s1252_s24, %s1490_s24  }
   0x7   : > { %s35_s9 = sadd.s32 1, %s1198_s28  ;;  %s44_s10 = sadd.s32 1, %s1190_s26 }
   0x8   : > { %p37_p0 = scmp.ge.s32.totalorder %s35_s9, 2  ;;  %p51_p1 = scmp.ne.s32.totalorder %s1190_s26, %s1186_s25 }
   0x9   : > { %p52_p2 = scmp.eq.s32.totalorder %s1202_s29, 0  ;;  %p57_p3 = scmp.ne.s32.totalorder %s1186_s25, %s1182_s24 }
   0xa   : > { %s1496_s9 = smov (%p37_p0, %s35_s9), 0  ;;  %p58_p5 = scmp.eq.s32.totalorder %s941_s30, 0 }
   0xb   : > { %p1293_p4 = por %p52_p2, %p51_p1  ;;  %s39_s12 = ssub.s32 %s1198_s28, %s1496_s9 }
   0xc   : > { %p209_p6 = scmp.eq.s32.totalorder %s941_s30, 1  ;;  %p42_p7 = scmp.eq.s32.totalorder %s39_s12, 0 }
   0xd   : > { %p1299_p8 = por %p58_p5, %p57_p3  ;;  %p215_p10 = scmp.eq.s32.totalorder %s942_s8, 1 }
   0xe   : > { %p1303_p9 = por %p209_p6, %p51_p1  ;;  %p1032_p13 = scmp.lt.s32.totalorder %s1202_s29, 2 }
   0xf   : > { %s1308_s15 = scalar_select %p42_p7, %s1190_s26, %s44_s10  }
  0x10   : > { %s1483_s14 = scalar_select %p1303_p9, 1, 0 }
  0x11   : > { %p1310_p11 = por %p215_p10, %p57_p3  ;;  %s253_s17 = sand.u32 1, %s1190_s26  }
  0x12   : > { %s1015_s18 = smul.u32 48, %s253_s17  ;;  %p1320_p0 = pnand %p1032_p13, %p1293_p4 }
  0x13   : > { %s1484_s16 = scalar_select %p1310_p11, 1, 0 }
  0x14   : > { %s1016_s19 = smul.u32 768, %s1198_s28  ;;  %s257_s30 = scalar_lea.vmem [#allocation2], %s1015_s18 }
  0x15   : > { %s266_s8 = sshll.u32 %s257_s30, 4  ;;  %s1332_s10 = scalar_lea.sflag [#allocation3], %s253_s17  ;;  %s1329_s8 = int_to_ptr.vmem [resolvable:$true] %s266_s8 }
  0x16   : > { %s1327_s23 = scalar_lea.hbm %s1472_s0, %s1016_s19  ;;  %p1092_p3 = pneg %p1320_p0 }
  0x17   : > { %s1090_s11 = scalar_lea.hbm %s1327_s23, 768  ;;  %s1095_s21 = scalar_lea.hbm %s1472_s0, 1536 }
  0x18   : > { %p1091_p2 = scmp.ne.s32.totalorder %s1327_s23, %s1090_s11  ;;  %p1096_p6 = scmp.lt.u32.totalorder %s1327_s23, %s1472_s0 }
  0x19   : > { %p1097_p7 = scmp.lt.u32.totalorder %s1095_s21, %s1090_s11  ;;  %p1099_p13 = scmp.lt.u32.totalorder %s1090_s11, %s1327_s23 }
  0x1a   : > { %p1093_p4 = pnand %p1092_p3, %p1091_p2 }
  0x1b   : > { %p1098_p10 = por %p1097_p7, %p1096_p6 }
  0x1c   : > { %p1094_p5 = pneg %p1093_p4 }
  0x1d   : > { %p1100_p12 = por %p1099_p13, %p1098_p10 }
  0x1f   : > { %p1101_p1 = pnand %p1100_p12, %p1094_p5 }
  0x21   : > { %1104 = shalt.err (!%p1101_p1)
}
  0x22   : > { %s1105_s17 = scalar_lea.vmem %s1329_s8, 768  ;;  %s1204_s30 = smov [#allocation2]  }
  0x23   : > { %p1106_p2 = scmp.ne.s32.totalorder %s1329_s8, %s1105_s17  ;;  %s1110_s12 = sshll.u32 %s1204_s30, 4  ;;  %s1111_s12 = int_to_ptr.vmem [resolvable:$false] %s1110_s12 }
  0x24   : > { %s1112_s19 = scalar_lea.vmem %s1111_s12, 1536  ;;  %p1113_p9 = scmp.lt.s32.totalorder %s1329_s8, %s1111_s12 }
  0x25   : > { %p1108_p4 = pnand %p1106_p2, %p1092_p3  ;;  %p1114_p6 = scmp.lt.s32.totalorder %s1112_s19, %s1105_s17 }
  0x27   : > { %p1109_p11 = pneg %p1108_p4  ;;  %p1115_p7 = por %p1114_p6, %p1113_p9 }
  0x29   : > { %p1116_p10 = pnand %p1115_p7, %p1109_p11 }
  0x2b   : > { %1119 = shalt.err (!%p1116_p10)
}
  0x2c   : > { %s1205_s11 = smov 384   ;;  %s1206_s21 = smov 24  }
  0x2d   : > { %1027 = dma.hbm_to_vmem [thread:$0]  (!%p1320_p0), %s1327_s23, 768, %s1329_s8, %s1332_s10, %s1205_s11, %s1205_s11, %s1206_s21  }
  0x2e   : > { %p274_p12 = scmp.lt.s32.totalorder %s1202_s29, 3  ;;  %p1486_p1 = scmp.ge.s32.totalorder %s1202_s29, 1 }
  0x30   : > { %p275_p3 = pnand %p1486_p1, %p274_p12 }
  0x31   : > { %s1364_s22 = sand.u32 (!%p275_p3), 1, %s1186_s25  }
  0x32   : > { %278 = sbr.rel (%p275_p3) target bundleno = 751 (0x2ef), region = 48  ;;  %s281_s17 = scalar_lea.sflag (!%p275_p3), [#allocation3], %s1364_s22 }
  0x33   : > { %s1017_s18 = smul.u32 (!%p275_p3), 48, %s1364_s22 }
  0x35   : > { %s284_s30 = scalar_lea.vmem (!%p275_p3), [#allocation2], %s1017_s18 }
  0x39   : > { %1173 = dma.done.wait (%p1299_p8), %s281_s17, 768  }
  0x3a   : > { %1175 = vsyncadd (%p1299_p8), %s281_s17, 4294966528  ;;  %v1207_v0 = vmov 0.0   ;;  %v1208_v1 = vmov 0   ;;  %v318_v2 = vld [vmem:[%s284_s30 + $0x8] sm:$0xff]  ;;  %v321_v3 = vld [vmem:[%s284_s30 + $0x20] sm:$0xff]  ;;  %vm343_vm0 = vcmask 130048  }
  0x3b   : > { %414 = vmatprep.mubr.f32.mxu0 %v1207_v0  ;;  %1088 = vset.pattern.permute.xlu0 %v1208_v1  ;;  %v319_v4 = vld [vmem:[%s284_s30 + $0x10] sm:$0xff]  ;;  %v328_v5 = vmax.f32 %v318_v2, 0.0  ;;  %v331_v6 = vmax.f32 %v321_v3, 0.0  ;;  %v322_v7 = vld [vmem:[%s284_s30 + $0x28] sm:$0xff]  ;;  %v317_v9 = vld [vmem:[%s284_s30] sm:$0xff]  ;;  %v1209_v49 = vmov 0.0|0.0  }
  0x3c   : > { %1089 = vset.pattern.permute.xlu1 %v1208_v1  ;;  %v329_v8 = vmax.f32 %v319_v4, 0.0  ;;  %v320_v10 = vld [vmem:[%s284_s30 + $0x18] sm:$0xff]  ;;  %v332_v11 = vmax.f32 %v322_v7, 0.0  ;;  %v327_v12 = vmax.f32 %v317_v9, 0.0  ;;  %v323_v14 = vld [vmem:[%s1473_s1] sm:$0xff]  ;;  %vm1210_vm1 = vmmov 0  }
  0x3d   : > { %v330_v13 = vmax.f32 %v320_v10, 0.0  ;;  %v325_v15 = vld [vmem:[%s1474_s2] sm:$0xff]  ;;  %v992_v16 = vpack.c.bf16 %v331_v6, %v328_v5  ;;  %975 = vmatprep.mubr.msk.f32.mxu1 %vm343_vm0, %v323_v14  ;;  %v326_v19 = vld [vmem:[%s1474_s2 + $0x8] sm:$0xff]  ;;  %s1018_s21 = smul.u32 24, %s1364_s22  ;;  %s841_s8 = scalar_lea.sflag [#allocation4], %s1364_s22 }
  0x3e   : > { %335 = vperm.xlu0 %1088, %v325_v15   ;;  %v996_v17 = vpack.c.bf16 %v332_v11, %v329_v8  ;;  %v324_v20 = vld [vmem:[%s1473_s1 + $0x8] sm:$0xff]  ;;  %v681_v21 = vld [vmem:[%s1478_s6] sm:$0xff]  ;;  %s1019_s17 = smul.u32 384, %s1194_s27  ;;  %p1487_p9 = scmp.ne.s32.totalorder %s1483_s14, 0 }
  0x3f   : > { %v994_v18 = vpack.c.bf16 %v330_v13, %v327_v12  ;;  %993 = vmatprep.subr.bf16.mxu0 %v992_v16  ;;  %v502_v22 = vld [vmem:[%s1475_s3] sm:$0xff]  ;;  %v505_v24 = vld [vmem:[%s1476_s4 + $0x8] sm:$0xff]  ;;  %s314_s18 = scalar_lea.vmem [#allocation5], %s1018_s21  ;;  %s1211_s27 = smov [#allocation5]  }
  0x40   : > { %997 = vmatprep.subr.bf16.mxu1 %v996_v17  ;;  %v504_v23 = vld [vmem:[%s1476_s4] sm:$0xff]  ;;  %v503_v48 = vld [vmem:[%s1475_s3 + $0x8] sm:$0xff]  ;;  %s857_s30 = sshll.u32 %s314_s18, 4  ;;  %s1423_s23 = scalar_lea.hbm %s1479_s7, %s1019_s17  ;;  %s1425_s30 = int_to_ptr.vmem [resolvable:$true] %s857_s30 }
  0x41   : > { %995 = vmatpush1.bf16.msra.mxu0 %v994_v18  ;;  %999 = vmatpush3.bf16.msra.mxu1 %v996_v17  ;;  %s1120_s10 = scalar_lea.vmem %s1425_s30, 384  ;;  %s1124_s12 = sshll.u32 %s1211_s27, 4  ;;  %s1125_s12 = int_to_ptr.vmem [resolvable:$false] %s1124_s12 }
  0x42   : > { %340 = vperm.xlu0 %1088, %v326_v19   ;;  %514 = vperm.xlu1 %1089, %v504_v23   ;;  %p1121_p8 = scmp.ne.s32.totalorder %s1425_s30, %s1120_s10  ;;  %s1126_s19 = scalar_lea.vmem %s1125_s12, 768 }
  0x43   : > { %p1127_p5 = scmp.lt.s32.totalorder %s1425_s30, %s1125_s12  ;;  %p1128_p13 = scmp.lt.s32.totalorder %s1126_s19, %s1120_s10 }
  0x44   : > { %947 = vmatmul.mubr.msk.f32.vlgmr.msra.gmra.mrb[0].mxu0 %vm343_vm0, %v323_v14  ;;  %976 = vmatmul.mubr.msk.f32.vlgmr.msra.gmra.mrb[0].mxu1 %vm343_vm0, %v324_v20  ;;  %p1122_p11 = pnand %p1121_p8, %p1487_p9 }
  0x45   : > { %420 = vmatprep.mubr.f32.mxu0 %v1207_v0  ;;  %592 = vmatprep.mubr.f32.mxu1 %v1207_v0  ;;  %p1129_p2 = por %p1128_p13, %p1127_p5 }
  0x46   : > { %690 = vperm.xlu0 %1088, %v681_v21   ;;  %519 = vperm.xlu1 %1089, %v505_v24   ;;  %p1123_p0 = pneg %p1122_p11 }
  0x48   : > { %948 = vmatmul.mubr.msk.f32.gmra.mrb[2].mxu0 %vm343_vm0, %v324_v20  ;;  %p1130_p4 = pnand %p1129_p2, %p1123_p0 }
  0x49   : > { %982 = vmatprep.mubr.msk.f32.mxu0 %vm343_vm0, %v502_v22 }
  0xbd   : > { %v336_v25 = vpop.permute.xlu0 %335 }
  0xc1   : > { %v341_v26 = vpop.permute.xlu0 %340  ;;  %v515_v50 = vpop.permute.xlu1 %514 }
  0xc5   : > { %v520_v51 = vpop.permute.xlu1 %519  ;;  %v691_v10 = vpop.permute.xlu0 %690 }
 0x117   : > { %v416_v27 = vpop.f32.mrb[0].mxu0  ;;  %v977_v28 = vpop.f32.mrb[0].mxu1 }
 0x118   : > { %v418_v29 = vpop.f32.mrb[1].mxu0  ;;  %v499_v30 = vadd.f32 %v977_v28, %v341_v26  ;;  %v493_v31 = vpop.f32.mrb[1].mxu1  ;;  %v417_v32 = vadd.f32 %v416_v27, %v336_v25 }
 0x119   : > { %v494_v33 = vadd.f32 %v493_v31, %v336_v25  ;;  %v419_v35 = vadd.f32 %v418_v29, %v336_v25 }
 0x11a   : > { %v511_v34 = vmax.f32 %v499_v30, 0.0  ;;  %v506_v41 = vmax.f32 %v417_v32, 0.0 }
 0x11b   : > { %v422_v36 = vpop.f32.mrb[2].mxu0  ;;  %v508_v37 = vmax.f32 %v494_v33, 0.0  ;;  %v507_v44 = vmax.f32 %v419_v35, 0.0 }
 0x11c   : > { %v423_v38 = vadd.f32 %v422_v36, %v341_v26  ;;  %v424_v39 = vpop.f32.mrb[3].mxu0 }
 0x11d   : > { %v425_v40 = vadd.f32 %v424_v39, %v341_v26  ;;  %v1004_v42 = vpack.c.bf16 %v511_v34, %v508_v37 }
 0x11e   : > { %v509_v43 = vmax.f32 %v423_v38, 0.0 }
 0x11f   : > { %v510_v45 = vmax.f32 %v425_v40, 0.0  ;;  %1005 = vmatprep.subr.bf16.mxu0 %v1004_v42 }
 0x120   : > { %v1002_v46 = vpack.c.bf16 %v509_v43, %v506_v41  ;;  %1007 = vmatpush3.bf16.msra.mxu0 %v1004_v42 }
 0x121   : > { %v1000_v47 = vpack.c.bf16 %v510_v45, %v507_v44 }
 0x123   : > { %1001 = vmatprep.subr.bf16.mxu1 %v1000_v47  ;;  %983 = vmatmul.mubr.msk.f32.vlgmr.msra.gmra.mrb[4].mxu0 %vm343_vm0, %v503_v48 }
 0x124   : > { %1003 = vmatpush1.bf16.msra.mxu1 %v1002_v46  ;;  %760 = vmatprep.mubr.f32.mxu0 %v1207_v0 }
 0x125   : > { %1012 = vmatprep.subr.bf16.mxu1 %v1209_v49 }
 0x127   : > { %951 = vmatmul.mubr.msk.f32.vlgmr.msra.gmra.mrb[2].mxu1 %vm343_vm0, %v502_v22 }
 0x128   : > { %598 = vmatprep.mubr.f32.mxu1 %v1207_v0 }
 0x12b   : > { %952 = vmatmul.mubr.msk.f32.gmra.mrb[4].mxu1 %vm343_vm0, %v503_v48 }
 0x12c   : > { %989 = vmatprep.mubr.msk.f32.mxu1 %vm1210_vm1, %v1207_v0  ;;  %v680_v0 = vld [vmem:[%s1477_s5] sm:$0xff] }
 0x1f6   : > { %v984_v52 = vpop.f32.mrb[4].mxu0 }
 0x1f7   : > { %v677_v53 = vadd.f32 %v984_v52, %v520_v51  ;;  %v671_v54 = vpop.f32.mrb[5].mxu0 }
 0x1f8   : > { %v672_v55 = vadd.f32 %v671_v54, %v515_v50 }
 0x1f9   : > { %v687_v56 = vmax.f32 %v677_v53, 0.0 }
 0x1fa   : > { %v594_v57 = vpop.f32.mrb[2].mxu1  ;;  %v684_v58 = vmax.f32 %v672_v55, 0.0 }
 0x1fb   : > { %v596_v59 = vpop.f32.mrb[3].mxu1  ;;  %v595_v61 = vadd.f32 %v594_v57, %v515_v50 }
 0x1fc   : > { %v1013_v60 = vpack.c.bf16 %v687_v56, %v684_v58  ;;  %v597_v62 = vadd.f32 %v596_v59, %v515_v50 }
 0x1fd   : > { %v682_v4 = vmax.f32 %v595_v61, 0.0 }
 0x1fe   : > { %v600_v63 = vpop.f32.mrb[4].mxu1  ;;  %1014 = vmatpush3.bf16.msra.mxu1 %v1013_v60  ;;  %v683_v6 = vmax.f32 %v597_v62, 0.0 }
 0x1ff   : > { %v601_v1 = vadd.f32 %v600_v63, %v520_v51  ;;  %v602_v2 = vpop.f32.mrb[5].mxu1 }
 0x200   : > { %v603_v3 = vadd.f32 %v602_v2, %v520_v51 }
 0x201   : > { %v685_v5 = vmax.f32 %v601_v1, 0.0  ;;  %990 = vmatmul.mubr.msk.f32.vlgmr.msra.gmra.mrb[6].mxu1 %vm343_vm0, %v680_v0 }
 0x202   : > { %v686_v7 = vmax.f32 %v603_v3, 0.0 }
 0x203   : > { %v1010_v8 = vpack.c.bf16 %v685_v5, %v682_v4 }
 0x204   : > { %v1008_v9 = vpack.c.bf16 %v686_v7, %v683_v6 }
 0x206   : > { %1009 = vmatprep.subr.bf16.mxu0 %v1008_v9 }
 0x207   : > { %1011 = vmatpush1.bf16.msra.mxu0 %v1010_v8 }
 0x20a   : > { %955 = vmatmul.mubr.msk.f32.vlgmr.msra.gmra.mrb[6].mxu0 %vm343_vm0, %v680_v0 }
 0x2d4   : > { %v833_v11 = vpop.f32.mrb[6].mxu1 }
 0x2d5   : > { %v834_v12 = vadd.f32 %v833_v11, %v691_v10  ;;  %v991_v13 = vpop.f32.mrb[7].mxu1 }
 0x2d7   : > { %839 = vst [vmem:[%s314_s18 + $0x10] sm:$0xff] %v834_v12 }
 0x2dd   : > { %v762_v14 = vpop.f32.mrb[6].mxu0 }
 0x2de   : > { %v763_v15 = vadd.f32 %v762_v14, %v691_v10  ;;  %v764_v16 = vpop.f32.mrb[7].mxu0 }
 0x2df   : > { %v765_v17 = vadd.f32 %v764_v16, %v691_v10 }
 0x2e0   : > { %837 = vst [vmem:[%s314_s18] sm:$0xff] %v763_v15 }
 0x2e1   : > { %838 = vst [vmem:[%s314_s18 + $0x8] sm:$0xff] %v765_v17 }
 0x2e2   : > { %1133 = shalt.err (!%p1130_p4)
}
 0x2e3   : > { %s1134_s22 = scalar_lea.hbm %s1423_s23, 384  ;;  %s1138_s18 = scalar_lea.hbm %s1479_s7, 768 }
 0x2e4   : > { %p1135_p6 = scmp.ne.s32.totalorder %s1423_s23, %s1134_s22  ;;  %p1139_p12 = scmp.lt.u32.totalorder %s1423_s23, %s1479_s7 }
 0x2e5   : > { %p1140_p1 = scmp.lt.u32.totalorder %s1138_s18, %s1134_s22  ;;  %p1142_p8 = scmp.lt.u32.totalorder %s1134_s22, %s1423_s23 }
 0x2e6   : > { %p1136_p7 = pnand %p1135_p6, %p1487_p9 }
 0x2e7   : > { %p1141_p3 = por %p1140_p1, %p1139_p12 }
 0x2e8   : > { %p1137_p10 = pneg %p1136_p7 }
 0x2e9   : > { %p1143_p11 = por %p1142_p8, %p1141_p3 }
 0x2eb   : > { %p1144_p0 = pnand %p1143_p11, %p1137_p10 }
 0x2ed   : > { %1147 = shalt.err (!%p1144_p0)
}
 0x2ee   : > { %1022 = dma.vmem_to_hbm [thread:$0]  (%p1487_p9), %s1425_s30, 384, %s1423_s23, %s841_s8  }
 0x2ef PF: > { %s869_s20 = sand.u32 1, %s1182_s24   ;;  %p1488_p5 = scmp.ne.s32.totalorder %s1484_s16, 0 }
 0x2f0   : > { %p1489_p13 = scmp.ge.s32.totalorder %s1202_s29, 2  ;;  %s870_s10 = scalar_lea.sflag [#allocation4], %s869_s20 }
 0x2f2   : > { %p1029_p2 = pnand %p1489_p13, %p1488_p5 }
 0x2f4   : > { %1177 = dma.done.wait (!%p1029_p2), %s870_s10, 384  }
 0x2f5   : > { %1179 = vsyncadd (!%p1029_p2), %s870_s10, 4294966912  ;;  %s23_s29 = sadd.s32 1, %s1202_s29   ;;  %s1490_s24 = smov %s1186_s25 }
 0x2f6   : > { %p20_p4 = scmp.ge.s32.totalorder %s23_s29, 4   ;;  %s1491_s25 = smov %s1190_s26 }
 0x2f7   : > { %s1492_s26 = smov %s1308_s15  ;;  %s1493_s27 = smov %s1198_s28 }
 0x2f8   : > { %s1494_s28 = smov %s1496_s9  ;;  %22 = sbr.rel (!%p20_p4) target bundleno = 6 (0x6), region = 93 }
 0x2ff   :  { %875 = vsyncpa [#allocation3], 1 }
 0x300   :  { %877 = vsyncpa [#allocation3 + $0x1], 1 }
 0x301   :  { %878 = vsyncpa [#allocation4], 1 }
 0x302   :  { %880 = vsyncpa [#allocation4 + $0x1], 1 }

</bundles_post_ra>
